<compile_context>
chip_gen: v6e
topology: v6e:2x2x1
jax: 0.10.0
libtpu: 0.0.40
codegen_flags: <defaults>
</compile_context>

<pallas_src>
import functools

import jax
import jax.numpy as jnp
from jax.experimental import pallas as pl
from jax.experimental.pallas import tpu as pltpu


# ----------------------------------------------------------------------------
# Pallas kernel: K*K tap matmuls (f32 accumulate) + folded-BN bias + ReLU.
# ----------------------------------------------------------------------------
def _conv_bn_relu_kernel(w_ref, b_ref, x_ref, o_ref, *, tap_offsets, stride,
                         activation):
    # w_ref: (K*K, C_out, C_in)  BN-folded conv weight, native (x) dtype
    # b_ref: (C_out, 1)          BN-folded bias, f32
    # x_ref: (C_in, FLAT)        zero-padded input, (H_pad*W_pad+tail) on lanes
    # o_ref: (C_out, L_PAD)      wide-layout output: column j = oh*W_pad + ow
    l = o_ref.shape[-1]
    acc = jnp.zeros(o_ref.shape, jnp.float32)
    for tap, off in enumerate(tap_offsets):            # static K*K unroll
        if stride == 1:
            window = x_ref[:, pl.ds(off, l)]            # contiguous lane window
        else:
            # TODO(synk): strided lane loads are less battle-tested than the
            # stride-1 path; semantics are identical.
            window = x_ref[:, pl.ds(off, l, stride)]
        acc = acc + jnp.dot(w_ref[tap], window,
                            preferred_element_type=jnp.float32)
    y = acc + b_ref[...]                                # f32 epilogue
    if activation:
        y = jnp.maximum(y, 0.0)
    o_ref[...] = y.astype(o_ref.dtype)                  # single lane-dense store


def _round_up(x, m):
    return (x + m - 1) // m * m


# ----------------------------------------------------------------------------
# ConvBNReLU forward: Conv2d(bias=False) -> BatchNorm2d (running stats) -> ReLU
# ----------------------------------------------------------------------------
@functools.partial(jax.jit,
                   static_argnames=("stride", "padding", "eps", "activation"))
def conv_bn_relu_forward(x, weight, gamma, beta, running_mean, running_var, *,
                         stride=1, padding=1, eps=1e-5, activation=True):
    b, c_in, h, w = x.shape
    c_out, c_in_w, k, k2 = weight.shape
    assert c_in_w == c_in and k == k2 and stride >= 1 and padding >= 0

    h_pad, w_pad = h + 2 * padding, w + 2 * padding
    h_out = (h_pad - k) // stride + 1
    w_out = (w_pad - k) // stride + 1

    # Wide-layout output width, rounded up to 128 lanes (unmasked stores).
    l_pad = _round_up(h_out * w_pad, 128)
    tap_offsets = tuple(kh * w_pad + kw for kh in range(k) for kw in range(k))
    flat_needed = tap_offsets[-1] + stride * (l_pad - 1) + 1
    extra = max(0, flat_needed - h_pad * w_pad)
    extra_rows = -(-extra // w_pad)                      # ceil div
    flat_len = (h_pad + extra_rows) * w_pad

    # Single zero-pad (conv halo + flat tail in one op); reshape is free.
    x_padded = jnp.pad(x, ((0, 0), (0, 0),
                           (padding, padding + extra_rows),
                           (padding, padding)))
    x_flat = x_padded.reshape(b, c_in, flat_len)

    # Fold inference BatchNorm into the conv weight / bias (in f32, cast once):
    #   y = scale*conv(x) + (beta - mean*scale),  scale = gamma/sqrt(var+eps)
    f32 = jnp.float32
    scale = gamma.astype(f32) * jax.lax.rsqrt(running_var.astype(f32) + eps)
    w_f = weight.astype(f32) * scale[:, None, None, None]
    # Per-tap layout (K*K, C_out, C_in): tap = kh*K + kw.
    w_taps = jnp.transpose(w_f, (2, 3, 0, 1)).reshape(k * k, c_out, c_in)
    w_taps = w_taps.astype(x.dtype)                      # native MXU dtype
    bias = (beta.astype(f32) - running_mean.astype(f32) * scale).reshape(c_out, 1)
    # TODO(synk): training-mode BatchNorm (batch statistics + running-stat
    # update) is not implemented; this is the eval/inference forward pass.

    itemsize = x.dtype.itemsize
    vmem_est = (2 * c_in * flat_len * itemsize          # double-buffered input slab
                + 2 * c_out * l_pad * itemsize          # double-buffered output slab
                + k * k * c_out * c_in * itemsize       # resident folded weights
                + c_out * 4 + c_out * l_pad * 4)        # bias + f32 accumulator
    vmem_limit = int(min(100 * 2**20, max(32 * 2**20, 4 * vmem_est)))

    kernel = functools.partial(_conv_bn_relu_kernel, tap_offsets=tap_offsets,
                               stride=stride, activation=activation)
    out_wide = pl.pallas_call(
        kernel,
        out_shape=jax.ShapeDtypeStruct((b, c_out, l_pad), x.dtype),
        grid=(b,),
        in_specs=[
            pl.BlockSpec((k * k, c_out, c_in), lambda i: (0, 0, 0)),   # weights (resident)
            pl.BlockSpec((c_out, 1), lambda i: (0, 0)),                # folded bias
            pl.BlockSpec((pl.Squeezed(), c_in, flat_len), lambda i: (i, 0, 0)),
        ],
        out_specs=pl.BlockSpec((pl.Squeezed(), c_out, l_pad), lambda i: (i, 0, 0)),
        compiler_params=pltpu.CompilerParams(
            dimension_semantics=("parallel",),
            vmem_limit_bytes=vmem_limit),
        cost_estimate=pl.CostEstimate(
            flops=2 * b * k * k * c_in * c_out * l_pad,
            transcendentals=0,
            bytes_accessed=int((b * c_in * flat_len + b * c_out * l_pad
                                + k * k * c_out * c_in) * itemsize)),
    )(w_taps, bias, x_flat)

    # Un-widen: column j = oh*W_pad + ow  ->  (H_out, W_out).
    out = out_wide[:, :, :h_out * w_pad].reshape(b, c_out, h_out, w_pad)
    return out[:, :, :, :w_out]


# ----------------------------------------------------------------------------
# Pure-JAX reference (conv -> BN(eval) -> ReLU) for a correctness check.
# ----------------------------------------------------------------------------
def _reference(x, weight, gamma, beta, running_mean, running_var, *,
               stride, padding, eps, activation):
    y = jax.lax.conv_general_dilated(
        x, weight, window_strides=(stride, stride),
        padding=[(padding, padding), (padding, padding)],
        dimension_numbers=("NCHW", "OIHW", "NCHW"))
    inv = jax.lax.rsqrt(running_var + eps)
    y = (y - running_mean[None, :, None, None]) * (gamma * inv)[None, :, None, None] \
        + beta[None, :, None, None]
    if activation:
        y = jnp.maximum(y, 0.0)
    return y


if __name__ == "__main__":
    key = jax.random.PRNGKey(0)
    k1, k2, k3, k4, k5, k6 = jax.random.split(key, 6)
    B, C_IN, C_OUT, H, W, K = 2, 4, 8, 16, 16, 3

    x = jax.random.normal(k1, (B, C_IN, H, W), dtype=jnp.float32)
    weight = jax.random.normal(k2, (C_OUT, C_IN, K, K), dtype=jnp.float32) * 0.1
    gamma = jnp.abs(jax.random.normal(k3, (C_OUT,), dtype=jnp.float32)) + 0.5
    beta = jax.random.normal(k4, (C_OUT,), dtype=jnp.float32) * 0.1
    running_mean = jax.random.normal(k5, (C_OUT,), dtype=jnp.float32) * 0.05
    running_var = jnp.abs(jax.random.normal(k6, (C_OUT,), dtype=jnp.float32)) + 0.5

    out = conv_bn_relu_forward(x, weight, gamma, beta, running_mean, running_var,
                               stride=1, padding=1, eps=1e-5, activation=True)
    jax.block_until_ready(out)
    assert out.shape == (B, C_OUT, H, W) and out.dtype == jnp.float32

    ref = _reference(x, weight, gamma, beta, running_mean, running_var,
                     stride=1, padding=1, eps=1e-5, activation=True)
    assert jnp.allclose(out, ref, rtol=1e-4, atol=1e-4), \
        float(jnp.max(jnp.abs(out - ref)))

    # ConvBN without ReLU exercises the `activation` flag of the module.
    out2 = conv_bn_relu_forward(x, weight, gamma, beta, running_mean, running_var,
                                stride=1, padding=1, eps=1e-5, activation=False)
    jax.block_until_ready(out2)
    ref2 = _reference(x, weight, gamma, beta, running_mean, running_var,
                      stride=1, padding=1, eps=1e-5, activation=False)
    assert jnp.allclose(out2, ref2, rtol=1e-4, atol=1e-4)

    print("KERNEL_OK")
</pallas_src>

<mosaic_0001>
module attributes {stable_mosaic.version = 11 : i64} {
  func.func @_conv_bn_relu_kernel(%arg0: i32, %arg1: memref<9x8x4xf32, #tpu.memory_space<vmem>>, %arg2: memref<8x1xf32, #tpu.memory_space<vmem>>, %arg3: memref<1x4x432xf32, #tpu.memory_space<vmem>>, %arg4: memref<1x8x384xf32, #tpu.memory_space<vmem>>) attributes {dimension_semantics = [#tpu.dimension_semantics<parallel>], iteration_bounds = array<i64: 2>, scalar_prefetch = 0 : i64, scratch_operands = 0 : i64, tpu.core_type = #tpu.core_type<tc>, window_params = [{pipeline_mode = #tpu.pipeline_mode<synchronous>, transform_indices = @transform_0, window_bounds = array<i64: 9, 8, 4>}, {pipeline_mode = #tpu.pipeline_mode<synchronous>, transform_indices = @transform_1, window_bounds = array<i64: 8, 1>}, {transform_indices = @transform_2, window_bounds = array<i64: 1, 4, 432>}, {transform_indices = @transform_3, window_bounds = array<i64: 1, 8, 384>}]} {
    %cst = arith.constant 0.000000e+00 : f32
    %0 = vector.broadcast %cst : f32 to vector<8x384xf32>
    %c0 = arith.constant 0 : index
    %c0_0 = arith.constant 0 : index
    %c0_1 = arith.constant 0 : index
    %1 = vector.load %arg3[%c0, %c0_0, %c0_1] : memref<1x4x432xf32, #tpu.memory_space<vmem>>, vector<1x4x384xf32>
    %2 = vector.shape_cast %1 : vector<1x4x384xf32> to vector<4x384xf32>
    %c0_2 = arith.constant 0 : index
    %c0_3 = arith.constant 0 : index
    %c0_4 = arith.constant 0 : index
    %3 = vector.load %arg1[%c0_2, %c0_3, %c0_4] : memref<9x8x4xf32, #tpu.memory_space<vmem>>, vector<1x8x4xf32>
    %4 = vector.shape_cast %3 : vector<1x8x4xf32> to vector<8x4xf32>
    %cst_5 = arith.constant dense<0.000000e+00> : vector<8x384xf32>
    %5 = tpu.matmul %4, %2, %cst_5 {dimension_numbers = #tpu.dot_dimension_numbers<[1], [0], [0], [1], [0, 0, 1, 1], [], []>} : vector<8x4xf32>, vector<4x384xf32>, vector<8x384xf32> -> vector<8x384xf32>
    %6 = arith.addf %0, %5 : vector<8x384xf32>
    %c0_6 = arith.constant 0 : index
    %c0_7 = arith.constant 0 : index
    %c1 = arith.constant 1 : index
    %7 = vector.load %arg3[%c0_6, %c0_7, %c1] : memref<1x4x432xf32, #tpu.memory_space<vmem>>, vector<1x4x384xf32>
    %8 = vector.shape_cast %7 : vector<1x4x384xf32> to vector<4x384xf32>
    %c1_8 = arith.constant 1 : index
    %c0_9 = arith.constant 0 : index
    %c0_10 = arith.constant 0 : index
    %9 = vector.load %arg1[%c1_8, %c0_9, %c0_10] : memref<9x8x4xf32, #tpu.memory_space<vmem>>, vector<1x8x4xf32>
    %10 = vector.shape_cast %9 : vector<1x8x4xf32> to vector<8x4xf32>
    %cst_11 = arith.constant dense<0.000000e+00> : vector<8x384xf32>
    %11 = tpu.matmul %10, %8, %cst_11 {dimension_numbers = #tpu.dot_dimension_numbers<[1], [0], [0], [1], [0, 0, 1, 1], [], []>} : vector<8x4xf32>, vector<4x384xf32>, vector<8x384xf32> -> vector<8x384xf32>
    %12 = arith.addf %6, %11 : vector<8x384xf32>
    %c0_12 = arith.constant 0 : index
    %c0_13 = arith.constant 0 : index
    %c2 = arith.constant 2 : index
    %13 = vector.load %arg3[%c0_12, %c0_13, %c2] : memref<1x4x432xf32, #tpu.memory_space<vmem>>, vector<1x4x384xf32>
    %14 = vector.shape_cast %13 : vector<1x4x384xf32> to vector<4x384xf32>
    %c2_14 = arith.constant 2 : index
    %c0_15 = arith.constant 0 : index
    %c0_16 = arith.constant 0 : index
    %15 = vector.load %arg1[%c2_14, %c0_15, %c0_16] : memref<9x8x4xf32, #tpu.memory_space<vmem>>, vector<1x8x4xf32>
    %16 = vector.shape_cast %15 : vector<1x8x4xf32> to vector<8x4xf32>
    %cst_17 = arith.constant dense<0.000000e+00> : vector<8x384xf32>
    %17 = tpu.matmul %16, %14, %cst_17 {dimension_numbers = #tpu.dot_dimension_numbers<[1], [0], [0], [1], [0, 0, 1, 1], [], []>} : vector<8x4xf32>, vector<4x384xf32>, vector<8x384xf32> -> vector<8x384xf32>
    %18 = arith.addf %12, %17 : vector<8x384xf32>
    %c0_18 = arith.constant 0 : index
    %c0_19 = arith.constant 0 : index
    %c18 = arith.constant 18 : index
    %19 = vector.load %arg3[%c0_18, %c0_19, %c18] : memref<1x4x432xf32, #tpu.memory_space<vmem>>, vector<1x4x384xf32>
    %20 = vector.shape_cast %19 : vector<1x4x384xf32> to vector<4x384xf32>
    %c3 = arith.constant 3 : index
    %c0_20 = arith.constant 0 : index
    %c0_21 = arith.constant 0 : index
    %21 = vector.load %arg1[%c3, %c0_20, %c0_21] : memref<9x8x4xf32, #tpu.memory_space<vmem>>, vector<1x8x4xf32>
    %22 = vector.shape_cast %21 : vector<1x8x4xf32> to vector<8x4xf32>
    %cst_22 = arith.constant dense<0.000000e+00> : vector<8x384xf32>
    %23 = tpu.matmul %22, %20, %cst_22 {dimension_numbers = #tpu.dot_dimension_numbers<[1], [0], [0], [1], [0, 0, 1, 1], [], []>} : vector<8x4xf32>, vector<4x384xf32>, vector<8x384xf32> -> vector<8x384xf32>
    %24 = arith.addf %18, %23 : vector<8x384xf32>
    %c0_23 = arith.constant 0 : index
    %c0_24 = arith.constant 0 : index
    %c19 = arith.constant 19 : index
    %25 = vector.load %arg3[%c0_23, %c0_24, %c19] : memref<1x4x432xf32, #tpu.memory_space<vmem>>, vector<1x4x384xf32>
    %26 = vector.shape_cast %25 : vector<1x4x384xf32> to vector<4x384xf32>
    %c4 = arith.constant 4 : index
    %c0_25 = arith.constant 0 : index
    %c0_26 = arith.constant 0 : index
    %27 = vector.load %arg1[%c4, %c0_25, %c0_26] : memref<9x8x4xf32, #tpu.memory_space<vmem>>, vector<1x8x4xf32>
    %28 = vector.shape_cast %27 : vector<1x8x4xf32> to vector<8x4xf32>
    %cst_27 = arith.constant dense<0.000000e+00> : vector<8x384xf32>
    %29 = tpu.matmul %28, %26, %cst_27 {dimension_numbers = #tpu.dot_dimension_numbers<[1], [0], [0], [1], [0, 0, 1, 1], [], []>} : vector<8x4xf32>, vector<4x384xf32>, vector<8x384xf32> -> vector<8x384xf32>
    %30 = arith.addf %24, %29 : vector<8x384xf32>
    %c0_28 = arith.constant 0 : index
    %c0_29 = arith.constant 0 : index
    %c20 = arith.constant 20 : index
    %31 = vector.load %arg3[%c0_28, %c0_29, %c20] : memref<1x4x432xf32, #tpu.memory_space<vmem>>, vector<1x4x384xf32>
    %32 = vector.shape_cast %31 : vector<1x4x384xf32> to vector<4x384xf32>
    %c5 = arith.constant 5 : index
    %c0_30 = arith.constant 0 : index
    %c0_31 = arith.constant 0 : index
    %33 = vector.load %arg1[%c5, %c0_30, %c0_31] : memref<9x8x4xf32, #tpu.memory_space<vmem>>, vector<1x8x4xf32>
    %34 = vector.shape_cast %33 : vector<1x8x4xf32> to vector<8x4xf32>
    %cst_32 = arith.constant dense<0.000000e+00> : vector<8x384xf32>
    %35 = tpu.matmul %34, %32, %cst_32 {dimension_numbers = #tpu.dot_dimension_numbers<[1], [0], [0], [1], [0, 0, 1, 1], [], []>} : vector<8x4xf32>, vector<4x384xf32>, vector<8x384xf32> -> vector<8x384xf32>
    %36 = arith.addf %30, %35 : vector<8x384xf32>
    %c0_33 = arith.constant 0 : index
    %c0_34 = arith.constant 0 : index
    %c36 = arith.constant 36 : index
    %37 = vector.load %arg3[%c0_33, %c0_34, %c36] : memref<1x4x432xf32, #tpu.memory_space<vmem>>, vector<1x4x384xf32>
    %38 = vector.shape_cast %37 : vector<1x4x384xf32> to vector<4x384xf32>
    %c6 = arith.constant 6 : index
    %c0_35 = arith.constant 0 : index
    %c0_36 = arith.constant 0 : index
    %39 = vector.load %arg1[%c6, %c0_35, %c0_36] : memref<9x8x4xf32, #tpu.memory_space<vmem>>, vector<1x8x4xf32>
    %40 = vector.shape_cast %39 : vector<1x8x4xf32> to vector<8x4xf32>
    %cst_37 = arith.constant dense<0.000000e+00> : vector<8x384xf32>
    %41 = tpu.matmul %40, %38, %cst_37 {dimension_numbers = #tpu.dot_dimension_numbers<[1], [0], [0], [1], [0, 0, 1, 1], [], []>} : vector<8x4xf32>, vector<4x384xf32>, vector<8x384xf32> -> vector<8x384xf32>
    %42 = arith.addf %36, %41 : vector<8x384xf32>
    %c0_38 = arith.constant 0 : index
    %c0_39 = arith.constant 0 : index
    %c37 = arith.constant 37 : index
    %43 = vector.load %arg3[%c0_38, %c0_39, %c37] : memref<1x4x432xf32, #tpu.memory_space<vmem>>, vector<1x4x384xf32>
    %44 = vector.shape_cast %43 : vector<1x4x384xf32> to vector<4x384xf32>
    %c7 = arith.constant 7 : index
    %c0_40 = arith.constant 0 : index
    %c0_41 = arith.constant 0 : index
    %45 = vector.load %arg1[%c7, %c0_40, %c0_41] : memref<9x8x4xf32, #tpu.memory_space<vmem>>, vector<1x8x4xf32>
    %46 = vector.shape_cast %45 : vector<1x8x4xf32> to vector<8x4xf32>
    %cst_42 = arith.constant dense<0.000000e+00> : vector<8x384xf32>
    %47 = tpu.matmul %46, %44, %cst_42 {dimension_numbers = #tpu.dot_dimension_numbers<[1], [0], [0], [1], [0, 0, 1, 1], [], []>} : vector<8x4xf32>, vector<4x384xf32>, vector<8x384xf32> -> vector<8x384xf32>
    %48 = arith.addf %42, %47 : vector<8x384xf32>
    %c0_43 = arith.constant 0 : index
    %c0_44 = arith.constant 0 : index
    %c38 = arith.constant 38 : index
    %49 = vector.load %arg3[%c0_43, %c0_44, %c38] : memref<1x4x432xf32, #tpu.memory_space<vmem>>, vector<1x4x384xf32>
    %50 = vector.shape_cast %49 : vector<1x4x384xf32> to vector<4x384xf32>
    %c8 = arith.constant 8 : index
    %c0_45 = arith.constant 0 : index
    %c0_46 = arith.constant 0 : index
    %51 = vector.load %arg1[%c8, %c0_45, %c0_46] : memref<9x8x4xf32, #tpu.memory_space<vmem>>, vector<1x8x4xf32>
    %52 = vector.shape_cast %51 : vector<1x8x4xf32> to vector<8x4xf32>
    %cst_47 = arith.constant dense<0.000000e+00> : vector<8x384xf32>
    %53 = tpu.matmul %52, %50, %cst_47 {dimension_numbers = #tpu.dot_dimension_numbers<[1], [0], [0], [1], [0, 0, 1, 1], [], []>} : vector<8x4xf32>, vector<4x384xf32>, vector<8x384xf32> -> vector<8x384xf32>
    %54 = arith.addf %48, %53 : vector<8x384xf32>
    %c0_48 = arith.constant 0 : index
    %c0_49 = arith.constant 0 : index
    %55 = vector.load %arg2[%c0_48, %c0_49] : memref<8x1xf32, #tpu.memory_space<vmem>>, vector<8x1xf32>
    %56 = vector.broadcast %55 : vector<8x1xf32> to vector<8x384xf32>
    %57 = arith.addf %54, %56 : vector<8x384xf32>
    %cst_50 = arith.constant 0.000000e+00 : f32
    %58 = vector.broadcast %cst_50 : f32 to vector<8x384xf32>
    %59 = arith.maximumf %57, %58 : vector<8x384xf32>
    %c0_51 = arith.constant 0 : index
    %c0_52 = arith.constant 0 : index
    %c0_53 = arith.constant 0 : index
    %60 = vector.load %arg4[%c0_51, %c0_52, %c0_53] : memref<1x8x384xf32, #tpu.memory_space<vmem>>, vector<1x8x384xf32>
    %61 = vector.shape_cast %60 : vector<1x8x384xf32> to vector<8x384xf32>
    %62 = vector.shape_cast %59 : vector<8x384xf32> to vector<1x8x384xf32>
    tpu.vector_store %arg4[%c0_51, %c0_52, %c0_53], %62 {strides = array<i32>} : memref<1x8x384xf32, #tpu.memory_space<vmem>>, vector<1x8x384xf32>,
    return
  }
  func.func @transform_0(%arg0: i32) -> (i32, i32, i32) {
    %c0_i32 = arith.constant 0 : i32
    %c0_i32_0 = arith.constant 0 : i32
    %c0_i32_1 = arith.constant 0 : i32
    %c0_i32_2 = arith.constant 0 : i32
    return %c0_i32, %c0_i32_0, %c0_i32_1 : i32, i32, i32
  }
  func.func @transform_1(%arg0: i32) -> (i32, i32) {
    %c0_i32 = arith.constant 0 : i32
    %c0_i32_0 = arith.constant 0 : i32
    %c0_i32_1 = arith.constant 0 : i32
    return %c0_i32, %c0_i32_0 : i32, i32
  }
  func.func @transform_2(%arg0: i32) -> (i32, i32, i32) {
    %c0_i32 = arith.constant 0 : i32
    %c0_i32_0 = arith.constant 0 : i32
    %c0_i32_1 = arith.constant 0 : i32
    return %arg0, %c0_i32, %c0_i32_0 : i32, i32, i32
  }
  func.func @transform_3(%arg0: i32) -> (i32, i32, i32) {
    %c0_i32 = arith.constant 0 : i32
    %c0_i32_0 = arith.constant 0 : i32
    %c0_i32_1 = arith.constant 0 : i32
    return %arg0, %c0_i32, %c0_i32_0 : i32, i32, i32
  }
}

</mosaic_0001>

<bundles_post_ra>
// kernel: conv_bn_relu_forward.1
= control target key start
LH: loop header
LB: loop body
LE: loop exit
PB: predicated region body
PF: predicated region fallthrough
CT: control target
= control target key end

     0   :  { %s1966_s12 = smov 0   ;;  %s2125_s0 = inlined_call_operand.vmem [shape: f32[9,8,4], index: 0, kind: input, shape index: {}]   ;;  %s2126_s1 = inlined_call_operand.vmem [shape: f32[8,1], index: 1, kind: input, shape index: {}]   ;;  %s2127_s2 = inlined_call_operand.vmem [shape: f32[2,4,432], index: 2, kind: input, shape index: {}]   ;;  %s2128_s3 = inlined_call_operand.vmem [shape: f32[2,8,384], index: 3, kind: output, shape index: {}]  }
   0x1 LB: > { %s1777_s13 = sadd.s32 4294967295, %s1933_s12   ;;  %p1781_p0 = scmp.ge.s32.totalorder %s1933_s12, 1  ;;  %s1933_s12 = sphi %s1966_s12, %s13_s12  }
   0x2   : > { %p137_p1 = scmp.lt.s32.totalorder %s1933_s12, 3 }
   0x4   : > { %p138_p2 = pnand %p1781_p0, %p137_p1 }
   0x5   : > { %p161_p3 = scmp.lt.s32.totalorder (!%p138_p2), %s1777_s13, 1  ;;  %s1937_s18 = smov (!%p138_p2), 127  }
   0x6   : > { %141 = sbr.rel (%p138_p2) target bundleno = 394 (0x18a), region = 32  ;;  %s1938_s19 = smov (!%p138_p2), 126  }
   0x7   : > { %s1939_s20 = smov (!%p138_p2), 110   ;;  %s1940_s21 = smov (!%p138_p2), 109  }
   0x8   : > { %s1941_s22 = smov (!%p138_p2), 108   ;;  %s1942_s23 = smov (!%p138_p2), 92  }
   0x9   : > { %s1943_s24 = smov (!%p138_p2), 91   ;;  %s1945_s25 = smov (!%p138_p2), 90  }
   0xb   : > { %v1935_v0 = vmov 0.0   ;;  %s2130_s13 = smov (!%p161_p3, %s1777_s13), 1  ;;  %vm1936_vm0 = vmmov 0   ;;  %v1944_v5 = vmov 0   ;;  %v1707_v6 = vld [vmem:[%s2126_s1] sm:$0xff]  ;;  %vm189_vm1 = vcmask 1039360  }
   0xc   : > { %268 = vmatprep.mubr.f32.mxu0 %v1935_v0  ;;  %1859 = vmatprep.subr.mxu1 %v1935_v0  ;;  %s1840_s14 = sshll.u32 %s2130_s13, 4  ;;  %vm197_vm2 = vcmask 1043456   ;;  %v1785_v13 = vld [vmem:[%s2125_s0 + $0x8] sm:$0xff]  ;;  %vm193_vm3 = vcmask 31744   ;;  %vm512_vm4 = vcmask 1031168   ;;  %v173_v19 = vld [vmem:[%s2125_s0] sm:$0xff] }
   0xd   : > { %1861 = vmatprep.mubr.msk.f32.mxu1 %vm1936_vm0, %v1935_v0  ;;  %s1984_s17 = scalar_lea.vmem %s2127_s2, %s1840_s14  ;;  %1924 = vset.pattern.permute.xlu0 %v1944_v5  ;;  %vm685_vm5 = vcmask 900096   ;;  %v1796_v24 = vld [vmem:[%s2125_s0 + $0x10] sm:$0xff]  ;;  %v1802_v30 = vld [vmem:[%s2125_s0 + $0x18] sm:$0xff]  ;;  %vm858_vm6 = vcmask 891904   ;;  %v1808_v38 = vld [vmem:[%s2125_s0 + $0x20] sm:$0xff]  ;;  %vm1031_vm7 = vcmask 883712  }
   0xe   : > { %v174_v1 = vld [vmem:[%s1984_s17 + $0x8] sm:$0xff]  ;;  %v1988_v2 = vld [vmem:[%s1984_s17] sm:$0xff]  ;;  %vm1204_vm8 = vcmask 752640   ;;  %v1820_v54 = vld [vmem:[%s2125_s0 + $0x30] sm:$0xff]  ;;  %vm1377_vm9 = vcmask 744448   ;;  %vm1550_vm10 = vcmask 736256  }
   0xf   : > { %185 = vrot.lane.b32.xlu0 %v174_v1, %s1937_s18  ;;  %181 = vrot.lane.b32.xlu1 %v1988_v2, %s1937_s18  ;;  %v179_v3 = vcombine.high %v1988_v2, %v1988_v2  ;;  %v180_v4 = vcombine.high %v174_v1, %v174_v1  ;;  %v172_v18 = vld [vmem:[%s1984_s17 + $0x8] sm:$0xf]  ;;  %v1826_v62 = vld [vmem:[%s2125_s0 + $0x38] sm:$0xff] }
  0x10   : > { %v1814_v46 = vld [vmem:[%s2125_s0 + $0x28] sm:$0xff] }
  0x13   : > { %508 = vrot.lane.b32.xlu1 %v174_v1, %s1938_s19  ;;  %183 = vrot.lane.b32.xlu0 %v179_v3, %s1937_s18 }
  0x17   : > { %187 = vrot.lane.b32.xlu1 %v180_v4, %s1937_s18  ;;  %506 = vrot.lane.b32.xlu0 %v179_v3, %s1938_s19 }
  0x1b   : > { %510 = vrot.lane.b32.xlu1 %v180_v4, %s1938_s19  ;;  %504 = vrot.lane.b32.xlu0 %v1988_v2, %s1938_s19 }
  0x1f   : > { %681 = vrot.lane.b32.xlu1 %v174_v1, %s1939_s20  ;;  %679 = vrot.lane.b32.xlu0 %v179_v3, %s1939_s20 }
  0x23   : > { %683 = vrot.lane.b32.xlu1 %v180_v4, %s1939_s20  ;;  %677 = vrot.lane.b32.xlu0 %v1988_v2, %s1939_s20 }
  0x27   : > { %854 = vrot.lane.b32.xlu1 %v174_v1, %s1940_s21  ;;  %852 = vrot.lane.b32.xlu0 %v179_v3, %s1940_s21 }
  0x2b   : > { %856 = vrot.lane.b32.xlu1 %v180_v4, %s1940_s21  ;;  %850 = vrot.lane.b32.xlu0 %v1988_v2, %s1940_s21  ;;  %s1904_s21 = smul.u32 24, %s2130_s13 }
  0x2f   : > { %1027 = vrot.lane.b32.xlu1 %v174_v1, %s1941_s22  ;;  %1025 = vrot.lane.b32.xlu0 %v179_v3, %s1941_s22 }
  0x33   : > { %1029 = vrot.lane.b32.xlu1 %v180_v4, %s1941_s22  ;;  %1023 = vrot.lane.b32.xlu0 %v1988_v2, %s1941_s22 }
  0x37   : > { %1200 = vrot.lane.b32.xlu1 %v174_v1, %s1942_s23  ;;  %1198 = vrot.lane.b32.xlu0 %v179_v3, %s1942_s23 }
  0x3b   : > { %1202 = vrot.lane.b32.xlu1 %v180_v4, %s1942_s23  ;;  %1196 = vrot.lane.b32.xlu0 %v1988_v2, %s1942_s23 }
  0x3f   : > { %1373 = vrot.lane.b32.xlu1 %v174_v1, %s1943_s24  ;;  %1371 = vrot.lane.b32.xlu0 %v179_v3, %s1943_s24 }
  0x43   : > { %1375 = vrot.lane.b32.xlu1 %v180_v4, %s1943_s24  ;;  %1369 = vrot.lane.b32.xlu0 %v1988_v2, %s1943_s24  ;;  %s170_s24 = scalar_lea.vmem %s2128_s3, %s1904_s21 }
  0x47   : > { %1546 = vrot.lane.b32.xlu1 %v174_v1, %s1945_s25  ;;  %1544 = vrot.lane.b32.xlu0 %v179_v3, %s1945_s25 }
  0x4b   : > { %1548 = vrot.lane.b32.xlu1 %v180_v4, %s1945_s25  ;;  %1542 = vrot.lane.b32.xlu0 %v1988_v2, %s1945_s25 }
  0x4f   : > { %1710 = vperm.xlu0 %1924, %v1707_v6  }
  0x81   : > { %v186_v7 = vpop.permute.xlu0 %185  ;;  %v182_v8 = vpop.permute.xlu1 %181 }
  0x85   : > { %v509_v9 = vpop.permute.xlu1 %508  ;;  %v184_v10 = vpop.permute.xlu0 %183 }
  0x86   : > { %v191_v11 = vsel %vm189_vm1, %v184_v10, %v186_v7  ;;  %v190_v12 = vsel %vm189_vm1, %v182_v8, %v184_v10 }
  0x87   : > { %1786 = vmatprep.subr.msk.mxu0 %vm197_vm2, %v191_v11 }
  0x88   : > { %1787 = vmatpush1.msk.msra.mxu0 %vm197_vm2, %v190_v12 }
  0x89   : > { %v188_v14 = vpop.permute.xlu1 %187  ;;  %1791 = vmatprep.subr.msk.mxu0 %vm197_vm2, %v179_v3  ;;  %v507_v15 = vpop.permute.xlu0 %506  ;;  %1788 = vmatmul.mubr.msk.f32.vlgmr.msra.gmra.mxu0 %vm193_vm3, %v1785_v13 }
  0x8a   : > { %v514_v16 = vsel %vm512_vm4, %v507_v15, %v509_v9  ;;  %1792 = vmatpush1.msk.msra.mxu0 %vm197_vm2, %v1988_v2  ;;  %v192_v17 = vsel %vm189_vm1, %v186_v7, %v188_v14  ;;  %419 = vmatprep.mubr.f32.mxu0 %v1935_v0  ;;  %v1832_v7 = vld [vmem:[%s2125_s0 + $0x40] sm:$0xff] }
  0x8b   : > { %1860 = vmatpush3.msk.msra.mxu1 %vm197_vm2, %v192_v17  ;;  %1797 = vmatprep.subr.msk.mxu0 %vm197_vm2, %v514_v16 }
  0x8c   : > { %1862 = vmatmul.mubr.msk.f32.vlgmr.msra.gmra.mxu1 %vm193_vm3, %v1785_v13  ;;  %1864 = vmatprep.subr.mxu1 %v1935_v0 }
  0x8d   : > { %v511_v20 = vpop.permute.xlu1 %510  ;;  %v505_v21 = vpop.permute.xlu0 %504  ;;  %1865 = vmatpush3.msk.msra.mxu1 %vm197_vm2, %v172_v18  ;;  %1793 = vmatmul.mubr.msk.f32.vlgmr.msra.gmra.mxu0 %vm193_vm3, %v173_v19 }
  0x8e   : > { %v515_v22 = vsel %vm512_vm4, %v509_v9, %v511_v20  ;;  %v513_v23 = vsel %vm512_vm4, %v505_v21, %v507_v15  ;;  %1866 = vmatprep.mubr.msk.f32.mxu1 %vm1936_vm0, %v1935_v0  ;;  %1869 = vmatprep.subr.mxu1 %v1935_v0 }
  0x8f   : > { %1798 = vmatpush1.msk.msra.mxu0 %vm197_vm2, %v513_v23  ;;  %589 = vmatprep.mubr.f32.mxu0 %v1935_v0 }
  0x90   : > { %1867 = vmatmul.mubr.msk.f32.vlgmr.msra.gmra.mxu1 %vm193_vm3, %v173_v19 }
  0x91   : > { %1870 = vmatpush3.msk.msra.mxu1 %vm197_vm2, %v515_v22  ;;  %v682_v25 = vpop.permute.xlu1 %681  ;;  %v680_v26 = vpop.permute.xlu0 %679  ;;  %1871 = vmatprep.mubr.msk.f32.mxu1 %vm1936_vm0, %v1935_v0 }
  0x92   : > { %v687_v27 = vsel %vm685_vm5, %v680_v26, %v682_v25  ;;  %1874 = vmatprep.subr.mxu1 %v1935_v0  ;;  %1799 = vmatmul.mubr.msk.f32.vlgmr.msra.gmra.mxu0 %vm193_vm3, %v1796_v24 }
  0x93   : > { %1803 = vmatprep.subr.msk.mxu0 %vm197_vm2, %v687_v27  ;;  %762 = vmatprep.mubr.f32.mxu0 %v1935_v0 }
  0x94   : > { %1872 = vmatmul.mubr.msk.f32.vlgmr.msra.gmra.mxu1 %vm193_vm3, %v1796_v24 }
  0x95   : > { %v684_v28 = vpop.permute.xlu1 %683  ;;  %v678_v29 = vpop.permute.xlu0 %677  ;;  %1876 = vmatprep.mubr.msk.f32.mxu1 %vm1936_vm0, %v1935_v0 }
  0x96   : > { %v688_v31 = vsel %vm685_vm5, %v682_v25, %v684_v28  ;;  %v686_v32 = vsel %vm685_vm5, %v678_v29, %v680_v26 }
  0x97   : > { %1804 = vmatpush1.msk.msra.mxu0 %vm197_vm2, %v686_v32  ;;  %1875 = vmatpush3.msk.msra.mxu1 %vm197_vm2, %v688_v31 }
  0x98   : > { %1879 = vmatprep.subr.mxu1 %v1935_v0  ;;  %1805 = vmatmul.mubr.msk.f32.vlgmr.msra.gmra.mxu0 %vm193_vm3, %v1802_v30 }
  0x99   : > { %v855_v33 = vpop.permute.xlu1 %854  ;;  %v853_v34 = vpop.permute.xlu0 %852  ;;  %1877 = vmatmul.mubr.msk.f32.vlgmr.msra.gmra.mxu1 %vm193_vm3, %v1802_v30  ;;  %935 = vmatprep.mubr.f32.mxu0 %v1935_v0 }
  0x9a   : > { %v860_v35 = vsel %vm858_vm6, %v853_v34, %v855_v33  ;;  %1881 = vmatprep.mubr.msk.f32.mxu1 %vm1936_vm0, %v1935_v0 }
  0x9b   : > { %1809 = vmatprep.subr.msk.mxu0 %vm197_vm2, %v860_v35 }
  0x9d   : > { %v857_v36 = vpop.permute.xlu1 %856  ;;  %v851_v37 = vpop.permute.xlu0 %850 }
  0x9e   : > { %v861_v39 = vsel %vm858_vm6, %v855_v33, %v857_v36  ;;  %v859_v40 = vsel %vm858_vm6, %v851_v37, %v853_v34 }
  0x9f   : > { %1810 = vmatpush1.msk.msra.mxu0 %vm197_vm2, %v859_v40  ;;  %1880 = vmatpush3.msk.msra.mxu1 %vm197_vm2, %v861_v39 }
  0xa0   : > { %1811 = vmatmul.mubr.msk.f32.vlgmr.msra.gmra.mxu0 %vm193_vm3, %v1808_v38  ;;  %1884 = vmatprep.subr.mxu1 %v1935_v0 }
  0xa1   : > { %v1028_v41 = vpop.permute.xlu1 %1027  ;;  %v1026_v42 = vpop.permute.xlu0 %1025  ;;  %1882 = vmatmul.mubr.msk.f32.vlgmr.msra.gmra.mxu1 %vm193_vm3, %v1808_v38  ;;  %1108 = vmatprep.mubr.f32.mxu0 %v1935_v0 }
  0xa2   : > { %v1033_v43 = vsel %vm1031_vm7, %v1026_v42, %v1028_v41  ;;  %1886 = vmatprep.mubr.msk.f32.mxu1 %vm1936_vm0, %v1935_v0 }
  0xa3   : > { %1815 = vmatprep.subr.msk.mxu0 %vm197_vm2, %v1033_v43 }
  0xa5   : > { %v1030_v44 = vpop.permute.xlu1 %1029  ;;  %v1024_v45 = vpop.permute.xlu0 %1023 }
  0xa6   : > { %v1034_v47 = vsel %vm1031_vm7, %v1028_v41, %v1030_v44  ;;  %v1032_v48 = vsel %vm1031_vm7, %v1024_v45, %v1026_v42 }
  0xa7   : > { %1816 = vmatpush1.msk.msra.mxu0 %vm197_vm2, %v1032_v48  ;;  %1885 = vmatpush3.msk.msra.mxu1 %vm197_vm2, %v1034_v47 }
  0xa8   : > { %1817 = vmatmul.mubr.msk.f32.vlgmr.msra.gmra.mxu0 %vm193_vm3, %v1814_v46  ;;  %1887 = vmatmul.mubr.msk.f32.vlgmr.msra.gmra.mxu1 %vm193_vm3, %v1814_v46 }
  0xa9   : > { %v1201_v49 = vpop.permute.xlu1 %1200  ;;  %v1199_v50 = vpop.permute.xlu0 %1198  ;;  %1889 = vmatprep.subr.mxu1 %v1935_v0  ;;  %1281 = vmatprep.mubr.f32.mxu0 %v1935_v0 }
  0xaa   : > { %v1206_v51 = vsel %vm1204_vm8, %v1199_v50, %v1201_v49  ;;  %1891 = vmatprep.mubr.msk.f32.mxu1 %vm1936_vm0, %v1935_v0 }
  0xab   : > { %1821 = vmatprep.subr.msk.mxu0 %vm197_vm2, %v1206_v51 }
  0xad   : > { %v1203_v52 = vpop.permute.xlu1 %1202  ;;  %v1197_v53 = vpop.permute.xlu0 %1196 }
  0xae   : > { %v1207_v55 = vsel %vm1204_vm8, %v1201_v49, %v1203_v52  ;;  %v1205_v56 = vsel %vm1204_vm8, %v1197_v53, %v1199_v50 }
  0xaf   : > { %1822 = vmatpush1.msk.msra.mxu0 %vm197_vm2, %v1205_v56  ;;  %1890 = vmatpush3.msk.msra.mxu1 %vm197_vm2, %v1207_v55 }
  0xb0   : > { %1823 = vmatmul.mubr.msk.f32.vlgmr.msra.gmra.mxu0 %vm193_vm3, %v1820_v54  ;;  %1892 = vmatmul.mubr.msk.f32.vlgmr.msra.gmra.mxu1 %vm193_vm3, %v1820_v54 }
  0xb1   : > { %v1374_v57 = vpop.permute.xlu1 %1373  ;;  %v1372_v58 = vpop.permute.xlu0 %1371  ;;  %1894 = vmatprep.subr.mxu1 %v1935_v0  ;;  %1454 = vmatprep.mubr.f32.mxu0 %v1935_v0 }
  0xb2   : > { %v1379_v59 = vsel %vm1377_vm9, %v1372_v58, %v1374_v57  ;;  %1896 = vmatprep.mubr.msk.f32.mxu1 %vm1936_vm0, %v1935_v0 }
  0xb3   : > { %1827 = vmatprep.subr.msk.mxu0 %vm197_vm2, %v1379_v59 }
  0xb5   : > { %v1376_v60 = vpop.permute.xlu1 %1375  ;;  %v1370_v61 = vpop.permute.xlu0 %1369 }
  0xb6   : > { %v1380_v63 = vsel %vm1377_vm9, %v1374_v57, %v1376_v60  ;;  %v1378_v1 = vsel %vm1377_vm9, %v1370_v61, %v1372_v58 }
  0xb7   : > { %1828 = vmatpush1.msk.msra.mxu0 %vm197_vm2, %v1378_v1  ;;  %1895 = vmatpush3.msk.msra.mxu1 %vm197_vm2, %v1380_v63 }
  0xb8   : > { %1829 = vmatmul.mubr.msk.f32.vlgmr.msra.gmra.mxu0 %vm193_vm3, %v1826_v62  ;;  %1897 = vmatmul.mubr.msk.f32.vlgmr.msra.gmra.mxu1 %vm193_vm3, %v1826_v62 }
  0xb9   : > { %v1547_v2 = vpop.permute.xlu1 %1546  ;;  %v1545_v3 = vpop.permute.xlu0 %1544  ;;  %1899 = vmatprep.subr.mxu1 %v1935_v0  ;;  %1627 = vmatprep.mubr.f32.mxu0 %v1935_v0 }
  0xba   : > { %v1552_v4 = vsel %vm1550_vm10, %v1545_v3, %v1547_v2  ;;  %1901 = vmatprep.mubr.msk.f32.mxu1 %vm1936_vm0, %v1935_v0 }
  0xbb   : > { %1833 = vmatprep.subr.msk.mxu0 %vm197_vm2, %v1552_v4 }
  0xbd   : > { %v1549_v5 = vpop.permute.xlu1 %1548  ;;  %v1543_v6 = vpop.permute.xlu0 %1542 }
  0xbe   : > { %v1553_v8 = vsel %vm1550_vm10, %v1547_v2, %v1549_v5  ;;  %v1551_v9 = vsel %vm1550_vm10, %v1543_v6, %v1545_v3 }
  0xbf   : > { %1834 = vmatpush1.msk.msra.mxu0 %vm197_vm2, %v1551_v9  ;;  %1900 = vmatpush3.msk.msra.mxu1 %vm197_vm2, %v1553_v8 }
  0xc0   : > { %1835 = vmatmul.mubr.msk.f32.vlgmr.msra.gmra.mxu0 %vm193_vm3, %v1832_v7  ;;  %1902 = vmatmul.mubr.msk.f32.vlgmr.msra.gmra.mxu1 %vm193_vm3, %v1832_v7 }
  0xca   : > { %v1711_v61 = vpop.permute.xlu0 %1710 }
 0x149   : > { %v270_v10 = vpop.f32.mrf.mxu0 }
 0x14b   : > { %v272_v0 = vpop.f32.mrf.mxu0 }
 0x14c   : > { %v341_v11 = vpop.f32.mrf.mxu1 }
 0x14d   : > { %v421_v12 = vpop.f32.mrf.mxu0 }
 0x14e   : > { %v1863_v13 = vpop.f32.mrf.mxu1  ;;  %v422_v31 = vadd.f32 %v421_v12, %v270_v10 }
 0x14f   : > { %v423_v15 = vpop.f32.mrf.mxu0 }
 0x150   : > { %v492_v14 = vpop.f32.mrf.mxu1  ;;  %v424_v34 = vadd.f32 %v423_v15, %v272_v0 }
 0x151   : > { %v493_v32 = vadd.f32 %v492_v14, %v341_v11 }
 0x152   : > { %v1868_v16 = vpop.f32.mrf.mxu1  ;;  %v591_v18 = vpop.f32.mrf.mxu0 }
 0x153   : > { %v666_v35 = vadd.f32 %v591_v18, %v422_v31 }
 0x154   : > { %v662_v17 = vpop.f32.mrf.mxu1  ;;  %v593_v21 = vpop.f32.mrf.mxu0 }
 0x155   : > { %v668_v36 = vadd.f32 %v662_v17, %v493_v32  ;;  %v667_v40 = vadd.f32 %v593_v21, %v424_v34 }
 0x156   : > { %v1873_v19 = vpop.f32.mrf.mxu1 }
 0x158   : > { %v764_v23 = vpop.f32.mrf.mxu0 }
 0x159   : > { %v835_v20 = vpop.f32.mrf.mxu1  ;;  %v839_v41 = vadd.f32 %v764_v23, %v666_v35 }
 0x15a   : > { %v766_v25 = vpop.f32.mrf.mxu0  ;;  %v841_v42 = vadd.f32 %v835_v20, %v668_v36 }
 0x15b   : > { %v1878_v22 = vpop.f32.mrf.mxu1  ;;  %v840_v44 = vadd.f32 %v766_v25, %v667_v40 }
 0x160   : > { %v937_v27 = vpop.f32.mrf.mxu0 }
 0x161   : > { %v1008_v24 = vpop.f32.mrf.mxu1  ;;  %v1012_v45 = vadd.f32 %v937_v27, %v839_v41 }
 0x162   : > { %v939_v29 = vpop.f32.mrf.mxu0  ;;  %v1014_v46 = vadd.f32 %v1008_v24, %v841_v42 }
 0x163   : > { %v1883_v26 = vpop.f32.mrf.mxu1  ;;  %v1013_v51 = vadd.f32 %v939_v29, %v840_v44 }
 0x168   : > { %v1181_v28 = vpop.f32.mrf.mxu1  ;;  %v1110_v33 = vpop.f32.mrf.mxu0 }
 0x169   : > { %v1185_v52 = vadd.f32 %v1110_v33, %v1012_v45  ;;  %v1187_v53 = vadd.f32 %v1181_v28, %v1014_v46 }
 0x16a   : > { %v1888_v30 = vpop.f32.mrf.mxu1  ;;  %v1112_v38 = vpop.f32.mrf.mxu0 }
 0x16b   : > { %v1186_v54 = vadd.f32 %v1112_v38, %v1013_v51 }
 0x170   : > { %v1354_v37 = vpop.f32.mrf.mxu1  ;;  %v1283_v43 = vpop.f32.mrf.mxu0 }
 0x171   : > { %v1358_v55 = vadd.f32 %v1283_v43, %v1185_v52  ;;  %v1360_v56 = vadd.f32 %v1354_v37, %v1187_v53 }
 0x172   : > { %v1893_v39 = vpop.f32.mrf.mxu1  ;;  %v1285_v47 = vpop.f32.mrf.mxu0 }
 0x173   : > { %v1359_v58 = vadd.f32 %v1285_v47, %v1186_v54 }
 0x178   : > { %v1527_v48 = vpop.f32.mrf.mxu1  ;;  %v1456_v49 = vpop.f32.mrf.mxu0 }
 0x179   : > { %v1531_v59 = vadd.f32 %v1456_v49, %v1358_v55  ;;  %v1533_v60 = vadd.f32 %v1527_v48, %v1360_v56 }
 0x17a   : > { %v1898_v50 = vpop.f32.mrf.mxu1  ;;  %v1458_v57 = vpop.f32.mrf.mxu0 }
 0x17b   : > { %v1532_v1 = vadd.f32 %v1458_v57, %v1359_v58 }
 0x180   : > { %v1629_v62 = vpop.f32.mrf.mxu0  ;;  %v1700_v63 = vpop.f32.mrf.mxu1 }
 0x181   : > { %v1704_v2 = vadd.f32 %v1629_v62, %v1531_v59  ;;  %v1706_v3 = vadd.f32 %v1700_v63, %v1533_v60 }
 0x182   : > { %v1631_v4 = vpop.f32.mrf.mxu0  ;;  %v1903_v5 = vpop.f32.mrf.mxu1 }
 0x183   : > { %v1705_v6 = vadd.f32 %v1631_v4, %v1532_v1  ;;  %v1713_v7 = vadd.f32 %v1711_v61, %v1704_v2  ;;  %v1715_v8 = vadd.f32 %v1711_v61, %v1706_v3 }
 0x185   : > { %v1714_v9 = vadd.f32 %v1711_v61, %v1705_v6  ;;  %v1716_v10 = vmax.f32 %v1713_v7, 0.0  ;;  %v1718_v0 = vmax.f32 %v1715_v8, 0.0 }
 0x187   : > { %v1717_v11 = vmax.f32 %v1714_v9, 0.0  ;;  %1719 = vst [vmem:[%s170_s24] sm:$0xff] %v1716_v10  ;;  %1721 = vst [vmem:[%s170_s24 + $0x10] sm:$0xff] %v1718_v0 }
 0x189   : > { %1720 = vst [vmem:[%s170_s24 + $0x8] sm:$0xff] %v1717_v11 }
 0x18a PF: > { %s13_s12 = sadd.s32 1, %s1933_s12  }
 0x18b   : > { %p10_p4 = scmp.ge.s32.totalorder %s13_s12, 4  }
 0x18d   :  { %12 = sbr.rel (!%p10_p4) target bundleno = 1 (0x1), region = 70 }

</bundles_post_ra>
